<compile_context>
chip_gen: v6e
topology: v6e:2x2x1
jax: 0.10.0
libtpu: 0.0.40
codegen_flags: <defaults>
</compile_context>

<pallas_src>
import functools

import jax
import jax.numpy as jnp
from jax import lax
from jax.experimental import pallas as pl
from jax.experimental.pallas import tpu as pltpu


def _relu6(x):
    return jnp.clip(x, 0.0, 6.0)


# ----------------------------------------------------------------------------
# One-time hardware probe: determine pltpu.roll's rotation convention so the
# depthwise tap shifts use the right sign regardless of the convention.
# (Expected: pltpu.roll == jnp.roll, i.e. out[i] = x[(i - shift) % N].)
# ----------------------------------------------------------------------------
_ROLL_SIGN = None


def _get_roll_sign():
    global _ROLL_SIGN
    if _ROLL_SIGN is None:
        def probe(x_ref, o_ref):
            o_ref[...] = pltpu.roll(x_ref[...], shift=1, axis=1)

        x = jnp.arange(128, dtype=jnp.float32).reshape(1, 128)
        out = pl.pallas_call(
            probe, out_shape=jax.ShapeDtypeStruct((1, 128), jnp.float32))(x)
        out = jax.block_until_ready(out)
        # jnp.roll convention would put x[-1] == 127 at position 0.
        _ROLL_SIGN = -1 if float(out[0, 0]) == 127.0 else 1
    return _ROLL_SIGN


# ----------------------------------------------------------------------------
# Kernel
# ----------------------------------------------------------------------------
def inverted_residual_kernel(
    x_ref,      # (1, Cin, HW)   lane-dense activation
    w1_ref,     # (Cexp, Cin)    1x1 expand weight, BN1 scale folded in
    b1_ref,     # (Cexp, 1)      folded BN1 bias
    dw_ref,     # (9, Cexp, 1)   depthwise 3x3 taps, BN2 scale folded in
    b2_ref,     # (Cexp, 1)
    w3_ref,     # (Cout, Cexp)   1x1 project weight, BN3 scale folded in
    b3_ref,     # (Cout, 1)
    o_ref,      # (1, Cout, HW)
    *, H, W, Cexp, residual, roll_sign,
):
    HW = H * W
    x = x_ref[0]                                       # (Cin, HW)

    # ---- 1x1 expand conv (+ folded BN) + ReLU6 ----
    h1 = jnp.dot(w1_ref[...], x, preferred_element_type=jnp.float32)
    h1 = _relu6(h1 + b1_ref[...])                      # (Cexp, HW)

    # ---- 3x3 depthwise, stride 1, pad 1: 9 rolled FMAs + edge masks ----
    pos = lax.broadcasted_iota(jnp.int32, (1, HW), 1)
    row = pos // W
    col = pos % W
    acc = jnp.zeros((Cexp, HW), jnp.float32)
    for kh in range(3):
        for kw in range(3):
            dy, dx = kh - 1, kw - 1
            s = dy * W + dx                            # flattened spatial offset
            if s == 0:
                shifted = h1
            else:
                shifted = pltpu.roll(h1, shift=(roll_sign * s) % HW, axis=1)
            conds = []
            if dy < 0:
                conds.append(row >= -dy)
            if dy > 0:
                conds.append(row < H - dy)
            if dx < 0:
                conds.append(col >= -dx)
            if dx > 0:
                conds.append(col < W - dx)
            if conds:
                valid = conds[0]
                for c in conds[1:]:
                    valid = valid & c
                shifted = jnp.where(valid, shifted, 0.0)
            acc = acc + shifted * dw_ref[kh * 3 + kw]  # (Cexp,1) broadcast
    h2 = _relu6(acc + b2_ref[...])                     # (Cexp, HW)

    # ---- 1x1 project conv (+ folded BN) ----
    h3 = jnp.dot(w3_ref[...], h2, preferred_element_type=jnp.float32)
    h3 = h3 + b3_ref[...]                              # (Cout, HW)
    if residual:
        h3 = h3 + x
    o_ref[0] = h3


# ----------------------------------------------------------------------------
# Wrapper
# ----------------------------------------------------------------------------
def inverted_residual_pallas(x_nchw, kernel_params, *, residual):
    w1, b1, dw, b2, w3, b3 = kernel_params
    N, Cin, H, W = x_nchw.shape
    HW = H * W
    Cexp = w1.shape[0]
    Cout = w3.shape[0]

    # Free reshape: keep PyTorch NCHW memory order, just flatten spatial.
    x = x_nchw.reshape(N, Cin, HW)

    kernel = functools.partial(
        inverted_residual_kernel,
        H=H, W=W, Cexp=Cexp, residual=residual, roll_sign=_get_roll_sign())

    def whole(a):
        return pl.BlockSpec(a.shape, lambda n, _nd=a.ndim: (0,) * _nd)

    out = pl.pallas_call(
        kernel,
        out_shape=jax.ShapeDtypeStruct((N, Cout, HW), jnp.float32),
        grid_spec=pltpu.PrefetchScalarGridSpec(
            num_scalar_prefetch=0,
            grid=(N,),
            in_specs=[
                pl.BlockSpec((1, Cin, HW), lambda n: (n, 0, 0)),
                whole(w1), whole(b1), whole(dw), whole(b2), whole(w3), whole(b3),
            ],
            out_specs=pl.BlockSpec((1, Cout, HW), lambda n: (n, 0, 0)),
        ),
        # "parallel" lets v7x run the two images on its two TensorCores;
        # measured no-op on single-TC v5e/v6e.
        compiler_params=pltpu.CompilerParams(
            dimension_semantics=("parallel",)),
    )(x, w1, b1, dw, b2, w3, b3)
    return out.reshape(N, Cout, H, W)


# ----------------------------------------------------------------------------
# BN folding / weight layout prep (trace-time, tiny arrays)
# ----------------------------------------------------------------------------
def _fold_bn(gamma, beta, mean, var, eps=1e-5):
    scale = gamma / jnp.sqrt(var + eps)
    return scale, beta - mean * scale


def prepare_params(w1_oihw, bn1, dw_oihw, bn2, w3_oihw, bn3, eps=1e-5):
    """PyTorch-layout conv weights + BN stats -> BN-folded kernel params."""
    s1, b1 = _fold_bn(*bn1, eps=eps)
    s2, b2 = _fold_bn(*bn2, eps=eps)
    s3, b3 = _fold_bn(*bn3, eps=eps)
    Cexp = w1_oihw.shape[0]
    w1 = w1_oihw[:, :, 0, 0] * s1[:, None]                        # (Cexp, Cin)
    dw = dw_oihw[:, 0, :, :] * s2[:, None, None]                  # (Cexp, 3, 3)
    dw = jnp.transpose(dw.reshape(Cexp, 9), (1, 0))[:, :, None]   # (9, Cexp, 1)
    w3 = w3_oihw[:, :, 0, 0] * s3[:, None]                        # (Cout, Cexp)
    return (w1, b1[:, None], dw, b2[:, None], w3, b3[:, None])


# ----------------------------------------------------------------------------
# Pure-JAX reference (unfolded params, NCHW convs) for verification
# ----------------------------------------------------------------------------
def inverted_residual_reference(x, w1, bn1, dw, bn2, w3, bn3, *, residual,
                                eps=1e-5):
    dn = ('NCHW', 'OIHW', 'NCHW')

    def bn(h, p):
        gamma, beta, mean, var = p
        s = gamma / jnp.sqrt(var + eps)
        return (h * s[None, :, None, None]
                + (beta - mean * s)[None, :, None, None])

    h = lax.conv_general_dilated(x, w1, (1, 1), 'VALID', dimension_numbers=dn,
                                 precision=lax.Precision.HIGHEST)
    h = jnp.clip(bn(h, bn1), 0.0, 6.0)
    h = lax.conv_general_dilated(h, dw, (1, 1), 'SAME', dimension_numbers=dn,
                                 feature_group_count=dw.shape[0],
                                 precision=lax.Precision.HIGHEST)
    h = jnp.clip(bn(h, bn2), 0.0, 6.0)
    h = lax.conv_general_dilated(h, w3, (1, 1), 'VALID', dimension_numbers=dn,
                                 precision=lax.Precision.HIGHEST)
    h = bn(h, bn3)
    return h + x if residual else h


if __name__ == "__main__":
    key = jax.random.PRNGKey(0)

    # Module config: inp=4, outp=4, stride=1, expand_ratio=6, width 1.0 active.
    N, H, W = 2, 16, 16
    Cin, Cout = 4, 4
    stride, expand_ratio = 1, 6
    Cexp = Cin * expand_ratio                        # 24
    residual = (stride == 1 and Cin == Cout)         # True

    ks = jax.random.split(key, 8)
    # Conv weights in PyTorch OIHW layout.
    w1 = 0.1 * jax.random.normal(ks[0], (Cexp, Cin, 1, 1), jnp.float32)
    dw = 0.1 * jax.random.normal(ks[1], (Cexp, 1, 3, 3), jnp.float32)
    w3 = 0.1 * jax.random.normal(ks[2], (Cout, Cexp, 1, 1), jnp.float32)

    def bn_stats(k, c):
        k1, k2, k3, k4 = jax.random.split(k, 4)
        gamma = 1.0 + 0.1 * jax.random.normal(k1, (c,), jnp.float32)
        beta = 0.1 * jax.random.normal(k2, (c,), jnp.float32)
        mean = 0.1 * jax.random.normal(k3, (c,), jnp.float32)
        var = jax.random.uniform(k4, (c,), jnp.float32, 0.5, 1.5)
        return gamma, beta, mean, var

    bn1 = bn_stats(ks[3], Cexp)
    bn2 = bn_stats(ks[4], Cexp)
    bn3 = bn_stats(ks[5], Cout)

    # Input in the PyTorch NCHW convention (no boundary transposes needed).
    x = jax.random.normal(ks[6], (N, Cin, H, W), jnp.float32)

    params = prepare_params(w1, bn1, dw, bn2, w3, bn3)
    out = inverted_residual_pallas(x, params, residual=residual)
    out = jax.block_until_ready(out)

    ref = inverted_residual_reference(x, w1, bn1, dw, bn2, w3, bn3,
                                      residual=residual)
    assert out.shape == (N, Cout, H, W)
    max_err = float(jnp.max(jnp.abs(out - ref)))
    assert jnp.allclose(out, ref, atol=2e-4, rtol=2e-4), max_err

    print("KERNEL_OK")
</pallas_src>

<mosaic_0001>
module attributes {stable_mosaic.version = 11 : i64} {
  func.func @probe(%arg0: memref<1x128xf32, #tpu.memory_space<vmem>>, %arg1: memref<1x128xf32, #tpu.memory_space<vmem>>) attributes {dimension_semantics = [], scalar_prefetch = 0 : i64, scratch_operands = 0 : i64, tpu.core_type = #tpu.core_type<tc>} {
    %c0 = arith.constant 0 : index
    %c0_0 = arith.constant 0 : index
    %0 = vector.load %arg0[%c0, %c0_0] : memref<1x128xf32, #tpu.memory_space<vmem>>, vector<1x128xf32>
    %c1_i32 = arith.constant 1 : i32
    %1 = tpu.dynamic_rotate %0 by %c1_i32 dim 1 : vector<1x128xf32>, i32 -> vector<1x128xf32>
    %c0_1 = arith.constant 0 : index
    %c0_2 = arith.constant 0 : index
    %2 = vector.load %arg1[%c0_1, %c0_2] : memref<1x128xf32, #tpu.memory_space<vmem>>, vector<1x128xf32>
    tpu.vector_store %arg1[%c0_1, %c0_2], %1 {strides = array<i32>} : memref<1x128xf32, #tpu.memory_space<vmem>>, vector<1x128xf32>,
    return
  }
}

</mosaic_0001>

<bundles_post_ra>
// kernel: tpu_custom_call.1
= control target key start
LH: loop header
LB: loop body
LE: loop exit
PB: predicated region body
PF: predicated region fallthrough
CT: control target
= control target key end

     0   :  { %6 = vsyncpa [#allocation3], 0  ;;  %s106_s0 = inlined_call_operand.hbm [shape: f32[1,128], index: 0, kind: input, shape index: {}]   ;;  %s107_s1 = inlined_call_operand.hbm [shape: f32[1,128], index: 1, kind: output, shape index: {}]  }
   0x1   :  { %7 = vsyncpa [#allocation4], 0  ;;  %s87_s6 = smov [#allocation2]  }
   0x2   :  { %s14_s7 = sshll.u32 %s87_s6, 4  ;;  %s15_s7 = int_to_ptr.vmem [resolvable:$true] %s14_s7 }
   0x3   :  { %s51_s8 = scalar_lea.vmem %s15_s7, 16  ;;  %s55_s9 = scalar_lea.vmem %s15_s7, 32 }
   0x4   :  { %p52_p0 = scmp.ne.s32.totalorder %s15_s7, %s51_s8  ;;  %p56_p1 = scmp.lt.s32.totalorder %s15_s7, %s15_s7 }
   0x5   :  { %p57_p2 = scmp.lt.s32.totalorder %s55_s9, %s51_s8 }
   0x7   :  { %p58_p3 = por %p57_p2, %p56_p1 }
   0x9   :  { %p59_p4 = pnand %p58_p3, %p52_p0 }
   0xb   :  { %62 = shalt.err (!%p59_p4)
}
   0xc   :  { %17 = dma.hbm_to_vmem [thread:$0]  %s106_s0, 16, %s15_s7, [#allocation3]  }
   0xd   :  { %83 = dma.done.wait [#allocation3], 16  }
   0xe   :  { %84 = vsyncadd [#allocation3], 4294967280  ;;  %v21_v0 = vld [vmem:[#allocation2] sm:$0x1]  ;;  %s88_s12 = smov 1   ;;  %s89_s13 = smov [#allocation5]  }
   0xf   :  { %22 = vrot.lane.b32.xlu0 %v21_v0, %s88_s12  ;;  %s31_s14 = sshll.u32 %s89_s13, 4  ;;  %s32_s14 = int_to_ptr.vmem [resolvable:$true] %s31_s14 }
  0x10   :  { %s63_s15 = scalar_lea.vmem %s32_s14, 16  ;;  %s67_s16 = scalar_lea.vmem %s32_s14, 32 }
  0x11   :  { %p64_p5 = scmp.ne.s32.totalorder %s32_s14, %s63_s15  ;;  %p68_p6 = scmp.lt.s32.totalorder %s32_s14, %s32_s14 }
  0x12   :  { %p69_p7 = scmp.lt.s32.totalorder %s67_s16, %s63_s15 }
  0x14   :  { %p70_p8 = por %p69_p7, %p68_p6 }
  0x16   :  { %p71_p9 = pnand %p70_p8, %p64_p5 }
  0x81   :  { %v23_v1 = vpop.permute.xlu0 %22 }
  0x82   :  { %24 = vst [vmem:[#allocation5] sm:$0x1] %v23_v1 }
  0x83   :  { %74 = shalt.err (!%p71_p9)
}
  0x84   :  { %34 = dma.vmem_to_hbm [thread:$0]  %s32_s14, 16, %s107_s1, [#allocation4]  }
  0x85   :  { %85 = dma.done.wait [#allocation4], 16  }
  0x86   :  { %86 = vsyncadd [#allocation4], 4294967280 }
  0x87   :  { %38 = vsyncpa [#allocation3], 1 }
  0x88   :  { %39 = vsyncpa [#allocation4], 1 }

</bundles_post_ra>
